<compile_context>
chip_gen: v7x
topology: tpu7x:2x2x1
jax: 0.10.0
libtpu: 0.0.40
codegen_flags: <defaults>
</compile_context>

<pallas_src>
import functools

import jax
import jax.numpy as jnp
from jax.experimental import pallas as pl
from jax.experimental.pallas import tpu as pltpu

MAX_PARTIALS = 2                          # leading 'parallel' axis (2 TCs on v7x)
_INPUT_VMEM_BUDGET = 24 * 1024 * 1024     # bytes: 3 inputs x 2 pipeline buffers
_VMEM_LIMIT_BYTES = 48 * 1024 * 1024      # explicit scoped-VMEM limit


def _cdiv(a, b):
    return -(-a // b)


def _round_up(a, b):
    return _cdiv(a, b) * b


def _distill_loss_kernel(x_ref, k_ref, t_ref, o_ref, acc_ref, *,
                         inv_T, kd_scale, bce_scale, n_valid,
                         tile_samples, steps_per_core, class_axis):
    ci = pl.program_id(0)          # partial-sum / core index ("parallel")
    i = pl.program_id(1)           # reduction step over sample tiles ("arbitrary")

    @pl.when(i == 0)
    def _():
        acc_ref[...] = jnp.zeros_like(acc_ref)

    x = x_ref[...].astype(jnp.float32)     # student logits
    k = k_ref[...].astype(jnp.float32)     # teacher logits
    tgt = t_ref[...].astype(jnp.float32)   # BCE targets

    sample_axis = 1 - class_axis

    # --- student: log_softmax(x / T) along the class axis ---
    xs = x * inv_T
    xs = xs - jnp.max(xs, axis=class_axis, keepdims=True)
    log_p = xs - jnp.log(jnp.sum(jnp.exp(xs), axis=class_axis, keepdims=True))

    # --- teacher: softmax(k / T) along the class axis (single exp) ---
    ks = k * inv_T
    ks = ks - jnp.max(ks, axis=class_axis, keepdims=True)
    e_k = jnp.exp(ks)
    s_k = jnp.sum(e_k, axis=class_axis, keepdims=True)
    log_q = ks - jnp.log(s_k)
    q = e_k * (1.0 / s_k)          # per-sample reciprocal, broadcast multiply

    # KLDivLoss(reduction='none')(log_p, q) == xlogy(q, q) - q*log_p.
    # q >= 0 (softmax); when q underflows to 0 both forms give 0, so this matches.
    kl = q * (log_q - log_p)

    # BCEWithLogitsLoss elementwise, numerically stable:
    # max(x,0) - x*t + log1p(exp(-|x|))
    bce = jnp.maximum(x, 0.0) - x * tgt + jnp.log1p(jnp.exp(-jnp.abs(x)))

    contrib = kl * kd_scale + bce * bce_scale

    # Mask out padded samples: global sample index >= n_valid contributes 0.
    base = (ci * steps_per_core + i) * tile_samples
    samp = jax.lax.broadcasted_iota(jnp.int32, contrib.shape, sample_axis) + base
    contrib = jnp.where(samp < n_valid, contrib, 0.0)

    acc_ref[...] += jnp.sum(contrib, keepdims=True)

    @pl.when(i == steps_per_core - 1)
    def _():
        o_ref[...] = (acc_ref[...] * (1.0 / n_valid)).reshape(o_ref.shape)


def distillation_loss(inputs, knowledge, target, *, T, alpha, tile_samples=None):
    assert inputs.shape == knowledge.shape == target.shape
    assert inputs.ndim == 2
    n, c = inputs.shape
    itemsize = max(jnp.dtype(inputs.dtype).itemsize,
                   jnp.dtype(knowledge.dtype).itemsize,
                   jnp.dtype(target.dtype).itemsize)

    # Lane-dense layout when C < 128: put samples on the lane axis.
    transpose = c < 128
    class_axis = 0 if transpose else 1
    sample_multiple = 128 if transpose else 8
    n_rounded = _round_up(n, sample_multiple)

    # Samples per grid step: as large as the VMEM budget allows, but no larger
    # than the (padded) batch.
    if tile_samples is None:
        per_sample_bytes = 6 * c * itemsize            # 3 inputs x 2 buffers
        tile = _INPUT_VMEM_BUDGET // max(per_sample_bytes, 1)
        tile = max(sample_multiple, (tile // sample_multiple) * sample_multiple)
    else:
        tile = _round_up(int(tile_samples), sample_multiple)
    tile = min(tile, n_rounded)

    total_tiles = _cdiv(n_rounded, tile)
    num_partials = min(MAX_PARTIALS, total_tiles)
    steps_per_core = _cdiv(total_tiles, num_partials)
    n_pad = num_partials * steps_per_core * tile
    pad = n_pad - n

    def prep(a):
        if pad:
            a = jnp.pad(a, ((0, pad), (0, 0)))
        return a.T if transpose else a

    xs, ks, ts = prep(inputs), prep(knowledge), prep(target)

    if transpose:
        blk = (c, tile)
        imap = lambda ci, i: (0, ci * steps_per_core + i)
    else:
        blk = (tile, c)
        imap = lambda ci, i: (ci * steps_per_core + i, 0)

    kernel = functools.partial(
        _distill_loss_kernel,
        inv_T=1.0 / float(T),
        kd_scale=float(alpha) * float(T) * float(T),
        bce_scale=1.0 - float(alpha),
        n_valid=n,
        tile_samples=tile,
        steps_per_core=steps_per_core,
        class_axis=class_axis,
    )

    partials = pl.pallas_call(
        kernel,
        out_shape=jax.ShapeDtypeStruct((num_partials, 1, 1), jnp.float32),
        grid_spec=pltpu.PrefetchScalarGridSpec(
            num_scalar_prefetch=0,
            grid=(num_partials, steps_per_core),
            in_specs=[pl.BlockSpec(blk, imap),
                      pl.BlockSpec(blk, imap),
                      pl.BlockSpec(blk, imap)],
            out_specs=pl.BlockSpec((1, 1, 1), lambda ci, i: (ci, 0, 0)),
            scratch_shapes=[pltpu.VMEM((1, 1), jnp.float32)],
        ),
        compiler_params=pltpu.CompilerParams(
            dimension_semantics=("parallel", "arbitrary"),
            vmem_limit_bytes=_VMEM_LIMIT_BYTES,
        ),
        cost_estimate=pl.CostEstimate(
            flops=15 * n * c,
            transcendentals=4 * n * c,
            bytes_accessed=3 * n_pad * c * itemsize + num_partials * 4,
        ),
    )(xs, ks, ts)

    return jnp.sum(partials)


def _reference_loss(inputs, knowledge, target, *, T, alpha):
    # pure-JAX reference mirroring the PyTorch module
    log_p = jax.nn.log_softmax(inputs / T, axis=1)
    q = jax.nn.softmax(knowledge / T, axis=1)
    kl = q * (jnp.log(q) - log_p)
    kl_term = jnp.mean(jnp.sum(kl, axis=1)) * (alpha * T * T)
    x = inputs
    bce = jnp.maximum(x, 0.0) - x * target + jnp.log1p(jnp.exp(-jnp.abs(x)))
    bce_term = jnp.sum(bce) / x.shape[0] * (1.0 - alpha)
    return kl_term + bce_term


if __name__ == "__main__":
    # Module hyperparameters (deterministic, in-script)
    T = 4.0
    alpha = 0.7

    key = jax.random.PRNGKey(0)

    def make(k, n, c):
        k1, k2, k3 = jax.random.split(k, 3)
        x = jax.random.normal(k1, (n, c), dtype=jnp.float32)
        kn = jax.random.normal(k2, (n, c), dtype=jnp.float32)
        tg = jax.random.uniform(k3, (n, c), dtype=jnp.float32)
        return x, kn, tg

    # (8, 32):   C < 128 -> lane-dense (transposed) path, single tile.
    # (16, 256): C >= 128 -> standard (samples x classes) path, single tile.
    # (40, 256) with tile_samples=16: multi-step reduction, both partial sums,
    #            and padded-sample masking exercised.
    # (300, 32) with tile_samples=128: transposed + multi-step + masking.
    cases = [((8, 32), None), ((16, 256), None), ((40, 256), 16), ((300, 32), 128)]
    for (n, c), tile in cases:
        x, kn, tg = make(jax.random.fold_in(key, n * 1000 + c), n, c)
        loss = distillation_loss(x, kn, tg, T=T, alpha=alpha, tile_samples=tile)
        loss = jax.block_until_ready(loss)
        ref = _reference_loss(x, kn, tg, T=T, alpha=alpha)
        assert jnp.allclose(loss, ref, rtol=1e-4, atol=1e-5), (n, c, loss, ref)

    print("KERNEL_OK")
</pallas_src>

<mosaic_0001>
module attributes {stable_mosaic.version = 11 : i64} {
  func.func @_distill_loss_kernel(%arg0: i32, %arg1: i32, %arg2: memref<32x128xf32, #tpu.memory_space<vmem>>, %arg3: memref<32x128xf32, #tpu.memory_space<vmem>>, %arg4: memref<32x128xf32, #tpu.memory_space<vmem>>, %arg5: memref<1x1x1xf32, #tpu.memory_space<vmem>>, %arg6: memref<1x1xf32, #tpu.memory_space<vmem>>) attributes {dimension_semantics = [#tpu.dimension_semantics<parallel>, #tpu.dimension_semantics<arbitrary>], iteration_bounds = array<i64: 1, 1>, scalar_prefetch = 0 : i64, scratch_operands = 1 : i64, tpu.core_type = #tpu.core_type<tc>, window_params = [{transform_indices = @transform_0, window_bounds = array<i64: 32, 128>}, {transform_indices = @transform_1, window_bounds = array<i64: 32, 128>}, {transform_indices = @transform_2, window_bounds = array<i64: 32, 128>}, {transform_indices = @transform_3, window_bounds = array<i64: 1, 1, 1>}]} {
    %c0_i32 = arith.constant 0 : i32
    %0 = arith.cmpi eq, %arg1, %c0_i32 : i32
    %1 = arith.extui %0 : i1 to i32
    %c0_i32_0 = arith.constant 0 : i32
    %2 = arith.cmpi ne, %1, %c0_i32_0 : i32
    scf.if %2 {
      %cst_24 = arith.constant 0.000000e+00 : f32
      %72 = vector.broadcast %cst_24 : f32 to vector<1x1xf32>
      %c0_25 = arith.constant 0 : index
      %c0_26 = arith.constant 0 : index
      %73 = vector.load %arg6[%c0_25, %c0_26] : memref<1x1xf32, #tpu.memory_space<vmem>>, vector<1x1xf32>
      tpu.vector_store %arg6[%c0_25, %c0_26], %72 {strides = array<i32>} : memref<1x1xf32, #tpu.memory_space<vmem>>, vector<1x1xf32>,
    } else {
    }
    %c0 = arith.constant 0 : index
    %c0_1 = arith.constant 0 : index
    %3 = vector.load %arg2[%c0, %c0_1] : memref<32x128xf32, #tpu.memory_space<vmem>>, vector<32x128xf32>
    %c0_2 = arith.constant 0 : index
    %c0_3 = arith.constant 0 : index
    %4 = vector.load %arg3[%c0_2, %c0_3] : memref<32x128xf32, #tpu.memory_space<vmem>>, vector<32x128xf32>
    %c0_4 = arith.constant 0 : index
    %c0_5 = arith.constant 0 : index
    %5 = vector.load %arg4[%c0_4, %c0_5] : memref<32x128xf32, #tpu.memory_space<vmem>>, vector<32x128xf32>
    %cst = arith.constant 2.500000e-01 : f32
    %6 = vector.broadcast %cst : f32 to vector<32x128xf32>
    %7 = arith.mulf %3, %6 : vector<32x128xf32>
    %cst_6 = arith.constant dense<0xFF800000> : vector<128xf32>
    %8 = vector.multi_reduction <maximumf>, %7, %cst_6 [0] : vector<32x128xf32> to vector<128xf32>
    %9 = vector.shape_cast %8 : vector<128xf32> to vector<1x128xf32>
    %10 = vector.broadcast %9 : vector<1x128xf32> to vector<32x128xf32>
    %11 = arith.subf %7, %10 : vector<32x128xf32>
    %12 = math.exp %11 : vector<32x128xf32>
    %cst_7 = arith.constant dense<0.000000e+00> : vector<128xf32>
    %13 = vector.multi_reduction <add>, %12, %cst_7 [0] : vector<32x128xf32> to vector<128xf32>
    %14 = vector.shape_cast %13 : vector<128xf32> to vector<1x128xf32>
    %15 = math.log %14 : vector<1x128xf32>
    %16 = vector.broadcast %15 : vector<1x128xf32> to vector<32x128xf32>
    %17 = arith.subf %11, %16 : vector<32x128xf32>
    %cst_8 = arith.constant 2.500000e-01 : f32
    %18 = vector.broadcast %cst_8 : f32 to vector<32x128xf32>
    %19 = arith.mulf %4, %18 : vector<32x128xf32>
    %cst_9 = arith.constant dense<0xFF800000> : vector<128xf32>
    %20 = vector.multi_reduction <maximumf>, %19, %cst_9 [0] : vector<32x128xf32> to vector<128xf32>
    %21 = vector.shape_cast %20 : vector<128xf32> to vector<1x128xf32>
    %22 = vector.broadcast %21 : vector<1x128xf32> to vector<32x128xf32>
    %23 = arith.subf %19, %22 : vector<32x128xf32>
    %24 = math.exp %23 : vector<32x128xf32>
    %cst_10 = arith.constant dense<0.000000e+00> : vector<128xf32>
    %25 = vector.multi_reduction <add>, %24, %cst_10 [0] : vector<32x128xf32> to vector<128xf32>
    %26 = vector.shape_cast %25 : vector<128xf32> to vector<1x128xf32>
    %27 = math.log %26 : vector<1x128xf32>
    %28 = vector.broadcast %27 : vector<1x128xf32> to vector<32x128xf32>
    %29 = arith.subf %23, %28 : vector<32x128xf32>
    %cst_11 = arith.constant 1.000000e+00 : f32
    %30 = vector.broadcast %cst_11 : f32 to vector<1x128xf32>
    %31 = arith.divf %30, %26 : vector<1x128xf32>
    %32 = vector.broadcast %31 : vector<1x128xf32> to vector<32x128xf32>
    %33 = arith.mulf %24, %32 : vector<32x128xf32>
    %34 = arith.subf %29, %17 : vector<32x128xf32>
    %35 = arith.mulf %33, %34 : vector<32x128xf32>
    %cst_12 = arith.constant 0.000000e+00 : f32
    %36 = vector.broadcast %cst_12 : f32 to vector<32x128xf32>
    %37 = arith.maximumf %3, %36 : vector<32x128xf32>
    %38 = arith.mulf %3, %5 : vector<32x128xf32>
    %39 = arith.subf %37, %38 : vector<32x128xf32>
    %40 = math.absf %3 : vector<32x128xf32>
    %cst_13 = arith.constant 0.000000e+00 : f32
    %41 = vector.broadcast %cst_13 : f32 to vector<32x128xf32>
    %42 = arith.subf %41, %40 : vector<32x128xf32>
    %43 = math.exp %42 : vector<32x128xf32>
    %44 = math.log1p %43 : vector<32x128xf32>
    %45 = arith.addf %39, %44 : vector<32x128xf32>
    %cst_14 = arith.constant 1.120000e+01 : f32
    %46 = vector.broadcast %cst_14 : f32 to vector<32x128xf32>
    %47 = arith.mulf %35, %46 : vector<32x128xf32>
    %cst_15 = arith.constant 3.000000e-01 : f32
    %48 = vector.broadcast %cst_15 : f32 to vector<32x128xf32>
    %49 = arith.mulf %45, %48 : vector<32x128xf32>
    %50 = arith.addf %47, %49 : vector<32x128xf32>
    %c1_i32 = arith.constant 1 : i32
    %51 = arith.muli %arg0, %c1_i32 : i32
    %52 = arith.addi %51, %arg1 : i32
    %c128_i32 = arith.constant 128 : i32
    %53 = arith.muli %52, %c128_i32 : i32
    %54 = tpu.iota {dimensions = array<i32: 1>} : vector<32x128xi32>
    %55 = vector.broadcast %53 : i32 to vector<32x128xi32>
    %56 = arith.addi %54, %55 : vector<32x128xi32>
    %c8_i32 = arith.constant 8 : i32
    %57 = vector.broadcast %c8_i32 : i32 to vector<32x128xi32>
    %58 = arith.cmpi slt, %56, %57 : vector<32x128xi32>
    %cst_16 = arith.constant 0.000000e+00 : f32
    %59 = vector.broadcast %cst_16 : f32 to vector<32x128xf32>
    %60 = arith.select %58, %50, %59 : vector<32x128xi1>, vector<32x128xf32>
    %c0_17 = arith.constant 0 : index
    %c0_18 = arith.constant 0 : index
    %61 = vector.load %arg6[%c0_17, %c0_18] : memref<1x1xf32, #tpu.memory_space<vmem>>, vector<1x1xf32>
    %62 = vector.shape_cast %60 : vector<32x128xf32> to vector<1x32x128xf32>
    %cst_19 = arith.constant dense<0.000000e+00> : vector<1xf32>
    %63 = vector.multi_reduction <add>, %62, %cst_19 [1, 2] : vector<1x32x128xf32> to vector<1xf32>
    %64 = vector.shape_cast %63 : vector<1xf32> to vector<1x1x1xf32>
    %65 = vector.extract %64[0, 0, 0] : f32 from vector<1x1x1xf32>
    %66 = vector.broadcast %65 : f32 to vector<1x1xf32>
    %67 = arith.addf %61, %66 : vector<1x1xf32>
    %c0_20 = arith.constant 0 : index
    %c0_21 = arith.constant 0 : index
    %68 = vector.load %arg6[%c0_20, %c0_21] : memref<1x1xf32, #tpu.memory_space<vmem>>, vector<1x1xf32>
    tpu.vector_store %arg6[%c0_20, %c0_21], %67 {strides = array<i32>} : memref<1x1xf32, #tpu.memory_space<vmem>>, vector<1x1xf32>,
    %c0_i32_22 = arith.constant 0 : i32
    %69 = arith.cmpi eq, %arg1, %c0_i32_22 : i32
    %70 = arith.extui %69 : i1 to i32
    %c0_i32_23 = arith.constant 0 : i32
    %71 = arith.cmpi ne, %70, %c0_i32_23 : i32
    scf.if %71 {
      %c0_24 = arith.constant 0 : index
      %c0_25 = arith.constant 0 : index
      %72 = vector.load %arg6[%c0_24, %c0_25] : memref<1x1xf32, #tpu.memory_space<vmem>>, vector<1x1xf32>
      %cst_26 = arith.constant 1.250000e-01 : f32
      %73 = vector.broadcast %cst_26 : f32 to vector<1x1xf32>
      %74 = arith.mulf %72, %73 : vector<1x1xf32>
      %75 = vector.shape_cast %74 : vector<1x1xf32> to vector<1x1x1xf32>
      %c0_27 = arith.constant 0 : index
      %c0_28 = arith.constant 0 : index
      %c0_29 = arith.constant 0 : index
      %76 = vector.load %arg5[%c0_27, %c0_28, %c0_29] : memref<1x1x1xf32, #tpu.memory_space<vmem>>, vector<1x1x1xf32>
      tpu.vector_store %arg5[%c0_27, %c0_28, %c0_29], %75 {strides = array<i32>} : memref<1x1x1xf32, #tpu.memory_space<vmem>>, vector<1x1x1xf32>,
    } else {
    }
    return
  }
  func.func @transform_0(%arg0: i32, %arg1: i32) -> (i32, i32) {
    %c1_i32 = arith.constant 1 : i32
    %0 = arith.muli %arg0, %c1_i32 : i32
    %1 = arith.addi %0, %arg1 : i32
    %c0_i32 = arith.constant 0 : i32
    %c0_i32_0 = arith.constant 0 : i32
    return %c0_i32, %1 : i32, i32
  }
  func.func @transform_1(%arg0: i32, %arg1: i32) -> (i32, i32) {
    %c1_i32 = arith.constant 1 : i32
    %0 = arith.muli %arg0, %c1_i32 : i32
    %1 = arith.addi %0, %arg1 : i32
    %c0_i32 = arith.constant 0 : i32
    %c0_i32_0 = arith.constant 0 : i32
    return %c0_i32, %1 : i32, i32
  }
  func.func @transform_2(%arg0: i32, %arg1: i32) -> (i32, i32) {
    %c1_i32 = arith.constant 1 : i32
    %0 = arith.muli %arg0, %c1_i32 : i32
    %1 = arith.addi %0, %arg1 : i32
    %c0_i32 = arith.constant 0 : i32
    %c0_i32_0 = arith.constant 0 : i32
    return %c0_i32, %1 : i32, i32
  }
  func.func @transform_3(%arg0: i32, %arg1: i32) -> (i32, i32, i32) {
    %c0_i32 = arith.constant 0 : i32
    %c0_i32_0 = arith.constant 0 : i32
    %c0_i32_1 = arith.constant 0 : i32
    return %arg0, %c0_i32, %c0_i32_0 : i32, i32, i32
  }
}

</mosaic_0001>

<bundles_post_ra>
// kernel: tpu_custom_call.1
= control target key start
LH: loop header
LB: loop body
LE: loop exit
PB: predicated region body
PF: predicated region fallthrough
CT: control target
= control target key end

     0   :  { %8 = vsyncpa [#allocation4], 0  ;;  %s665_s0 = inlined_call_operand.hbm [shape: f32[32,128], index: 0, kind: input, shape index: {}]   ;;  %s666_s1 = inlined_call_operand.hbm [shape: f32[32,128], index: 1, kind: input, shape index: {}]   ;;  %s667_s2 = inlined_call_operand.hbm [shape: f32[32,128], index: 2, kind: input, shape index: {}]   ;;  %s668_s3 = inlined_call_operand.hbm [shape: f32[1,1,1], index: 3, kind: output, shape index: {}]  }
   0x1   :  { %9 = vsyncpa [#allocation7], 0 }
   0x2   :  { %10 = vsyncpa [#allocation5], 0  ;;  %s451_s12 = smov [#allocation6]   ;;  %s452_s14 = smov [#allocation3]  }
   0x3   :  { %s34_s13 = sshll.u32 %s451_s12, 4  ;;  %s19_s15 = sshll.u32 %s452_s14, 4  ;;  %s35_s13 = int_to_ptr.vmem [resolvable:$true] %s34_s13  ;;  %s478_s15 = int_to_ptr.vmem [resolvable:$true] %s19_s15 }
   0x4   :  { %s357_s18 = scalar_lea.hbm %s666_s1, 512 }
   0x5   :  { %p358_p0 = scmp.ne.s32.totalorder %s666_s1, %s357_s18  ;;  %p361_p1 = scmp.lt.u32.totalorder %s357_s18, %s666_s1 }
   0x7   :  { %p363_p2 = pnand %p361_p1, %p358_p0 }
   0x9   :  { %366 = shalt.err (!%p363_p2)
}
   0xa   :  { %s367_s23 = scalar_lea.vmem %s35_s13, 512  ;;  %p372_p4 = scmp.lt.s32.totalorder %s35_s13, %s35_s13 }
   0xb   :  { %p368_p3 = scmp.ne.s32.totalorder %s35_s13, %s367_s23  ;;  %p373_p5 = scmp.lt.s32.totalorder %s367_s23, %s367_s23 }
   0xd   :  { %p374_p6 = por %p373_p5, %p372_p4 }
   0xf   :  { %p375_p7 = pnand %p374_p6, %p368_p3 }
  0x11   :  { %378 = shalt.err (!%p375_p7)
}
  0x12   :  { %s453_s24 = smov 128   ;;  %s454_s25 = smov 8  }
  0x13   :  { %40 = dma.hbm_to_vmem [thread:$0]  %s666_s1, 512, %s35_s13, [#allocation7], %s453_s24, %s453_s24, %s454_s25  }
  0x14   :  { %s379_s30 = scalar_lea.hbm %s665_s0, 512 }
  0x15   :  { %p380_p8 = scmp.ne.s32.totalorder %s665_s0, %s379_s30  ;;  %p383_p9 = scmp.lt.u32.totalorder %s379_s30, %s665_s0 }
  0x17   :  { %p385_p10 = pnand %p383_p9, %p380_p8 }
  0x19   :  { %388 = shalt.err (!%p385_p10)
}
  0x1a   :  { %s389_s8 = scalar_lea.vmem %s478_s15, 512  ;;  %p394_p12 = scmp.lt.s32.totalorder %s478_s15, %s478_s15 }
  0x1b   :  { %p390_p11 = scmp.ne.s32.totalorder %s478_s15, %s389_s8  ;;  %p395_p13 = scmp.lt.s32.totalorder %s389_s8, %s389_s8 }
  0x1d   :  { %p396_p0 = por %p395_p13, %p394_p12 }
  0x1f   :  { %p397_p1 = pnand %p396_p0, %p390_p11 }
  0x21   :  { %400 = shalt.err (!%p397_p1)
}
  0x22   :  { %25 = dma.hbm_to_vmem [thread:$0]  %s665_s0, 512, %s478_s15, [#allocation4], %s453_s24, %s453_s24, %s454_s25  }
  0x23   :  { %s455_s10 = smov [#allocation8]   ;;  %s401_s14 = scalar_lea.hbm %s667_s2, 512 }
  0x24   :  { %s49_s11 = sshll.u32 %s455_s10, 4  ;;  %p402_p2 = scmp.ne.s32.totalorder %s667_s2, %s401_s14  ;;  %s50_s11 = int_to_ptr.vmem [resolvable:$true] %s49_s11 }
  0x25   :  { %p405_p3 = scmp.lt.u32.totalorder %s401_s14, %s667_s2 }
  0x27   :  { %p407_p4 = pnand %p405_p3, %p402_p2 }
  0x29   :  { %410 = shalt.err (!%p407_p4)
}
  0x2a   :  { %s411_s20 = scalar_lea.vmem %s50_s11, 512  ;;  %p416_p6 = scmp.lt.s32.totalorder %s50_s11, %s50_s11 }
  0x2b   :  { %p412_p5 = scmp.ne.s32.totalorder %s50_s11, %s411_s20  ;;  %p417_p7 = scmp.lt.s32.totalorder %s411_s20, %s411_s20 }
  0x2d   :  { %p418_p8 = por %p417_p7, %p416_p6 }
  0x2f   :  { %p419_p9 = pnand %p418_p8, %p412_p5 }
  0x31   :  { %422 = shalt.err (!%p419_p9)
}
  0x32   :  { %55 = dma.hbm_to_vmem [thread:$0]  %s667_s2, 512, %s50_s11, [#allocation7], %s453_s24, %s453_s24, %s454_s25  }
  0x33   :  { %445 = dma.done.wait [#allocation4], 512  }
  0x34   :  { %446 = vsyncadd [#allocation4], 4294966784 }
  0x35   :  { %447 = dma.done.wait [#allocation7], 1024  }
  0x36   :  { %448 = vsyncadd [#allocation7], 4294966272  ;;  %v530_v0 = vld [vmem:[#allocation3] sm:$0xff]  ;;  %v532_v1 = vld [vmem:[#allocation3 + $0x8] sm:$0xff]  ;;  %vm72_vm5 = vcmask 0   ;;  %s457_s21 = smov [#allocation9]  }
  0x37   :  { %v534_v2 = vld [vmem:[#allocation3 + $0x10] sm:$0xff]  ;;  %v536_v3 = vld [vmem:[#allocation3 + $0x18] sm:$0xff]  ;;  %v78_v4 = vld [vmem:[#allocation6] sm:$0xff]  ;;  %v86_v6 = vmul.f32 0.25, %v530_v0  ;;  %v87_v7 = vmul.f32 0.25, %v532_v1  ;;  %s300_s22 = sshll.u32 %s457_s21, 4  ;;  %s301_s22 = int_to_ptr.vmem [resolvable:$true] %s300_s22 }
  0x38   :  { %v79_v5 = vld [vmem:[#allocation6 + $0x8] sm:$0xff]  ;;  %v88_v8 = vmul.f32 0.25, %v534_v2  ;;  %v80_v9 = vld [vmem:[#allocation6 + $0x10] sm:$0xff]  ;;  %v81_v10 = vld [vmem:[#allocation6 + $0x18] sm:$0xff]  ;;  %v89_v11 = vmul.f32 0.25, %v536_v3  ;;  %v126_v12 = vmul.f32 0.25, %v78_v4  ;;  %p428_p11 = scmp.lt.s32.totalorder %s301_s22, %s301_s22 }
  0x39   :  { %v127_v13 = vmul.f32 0.25, %v79_v5  ;;  %v90_v14 = vmax.f32 %v86_v6, %v87_v7  ;;  %v128_v15 = vmul.f32 0.25, %v80_v9  ;;  %v129_v16 = vmul.f32 0.25, %v81_v10  ;;  %s423_s23 = scalar_lea.vmem %s301_s22, 16  ;;  %s427_s24 = scalar_lea.vmem %s301_s22, 32 }
  0x3a   :  { %v91_v17 = vmax.f32 %v88_v8, %v89_v11  ;;  %v192_v22 = vand.u32 2147483647, %v530_v0  ;;  %v193_v25 = vand.u32 2147483647, %v532_v1  ;;  %v194_v28 = vand.u32 2147483647, %v534_v2  ;;  %p424_p10 = scmp.ne.s32.totalorder %s301_s22, %s423_s23  ;;  %p429_p12 = scmp.lt.s32.totalorder %s427_s24, %s423_s23 }
  0x3b   :  { %v130_v18 = vmax.f32 %v126_v12, %v127_v13  ;;  %v131_v19 = vmax.f32 %v128_v15, %v129_v16  ;;  %v195_v49 = vand.u32 2147483647, %v536_v3 }
  0x3c   :  { %v92_v20 = vmax.f32 %v90_v14, %v91_v17  ;;  %v196_v29 = vsub.f32 0.0, %v192_v22  ;;  %v197_v32 = vsub.f32 0.0, %v193_v25  ;;  %v198_v35 = vsub.f32 0.0, %v194_v28  ;;  %p430_p13 = por %p429_p12, %p428_p11 }
  0x3d   :  { %v132_v21 = vmax.f32 %v130_v18, %v131_v19  ;;  %v199_v59 = vsub.f32 0.0, %v195_v49 }
  0x3e   :  { %v93_v23 = vrot.slane %v92_v20, 4  ;;  %v200_v36 = vmul.f32 1.442695, %v196_v29  ;;  %v202_v39 = vmul.f32 1.442695, %v197_v32  ;;  %p431_p0 = pnand %p430_p13, %p424_p10 }
  0x3f   :  { %v133_v24 = vrot.slane %v132_v21, 4  ;;  %v204_v42 = vmul.f32 1.442695, %v198_v35  ;;  %v206_v62 = vmul.f32 1.442695, %v199_v59 }
  0x40   :  { %v94_v26 = vmax.f32 %v92_v20, %v93_v23  ;;  %319 = vpow2.f32 %v200_v36 }
  0x41   :  { %v134_v27 = vmax.f32 %v132_v21, %v133_v24  ;;  %321 = vpow2.f32 %v202_v39 }
  0x42   :  { %v95_v30 = vrot.slane %v94_v26, 2  ;;  %323 = vpow2.f32 %v204_v42  ;;  %v84_v42 = vld [vmem:[#allocation8 + $0x10] sm:$0xff] }
  0x43   :  { %v135_v31 = vrot.slane %v134_v27, 2 }
  0x44   :  { %v96_v33 = vmax.f32 %v94_v26, %v95_v30 }
  0x45   :  { %v136_v34 = vmax.f32 %v134_v27, %v135_v31 }
  0x46   :  { %v97_v37 = vrot.slane %v96_v33, 1 }
  0x47   :  { %v137_v38 = vrot.slane %v136_v34, 1 }
  0x48   :  { %v98_v40 = vmax.f32 %v96_v33, %v97_v37 }
  0x49   :  { %v138_v41 = vmax.f32 %v136_v34, %v137_v38  ;;  %v82_v38 = vld [vmem:[#allocation8] sm:$0xff] }
  0x4a   :  { %v545_v43 = vsub.f32 %v86_v6, %v98_v40  ;;  %v547_v44 = vsub.f32 %v87_v7, %v98_v40  ;;  %v549_v45 = vsub.f32 %v88_v8, %v98_v40  ;;  %v551_v46 = vsub.f32 %v89_v11, %v98_v40  ;;  %v570_v61 = vpop.eup %319 }
  0x4b   :  { %v553_v47 = vsub.f32 %v126_v12, %v138_v41  ;;  %v555_v48 = vsub.f32 %v127_v13, %v138_v41  ;;  %v561_v53 = vsub.f32 %v128_v15, %v138_v41  ;;  %v564_v55 = vsub.f32 %v129_v16, %v138_v41  ;;  %v572_v63 = vpop.eup %321  ;;  %v83_v41 = vld [vmem:[#allocation8 + $0x8] sm:$0xff] }
  0x4c   :  { %v103_v50 = vmul.f32 1.442695, %v545_v43  ;;  %v105_v51 = vmul.f32 1.442695, %v547_v44  ;;  %v107_v52 = vmul.f32 1.442695, %v549_v45  ;;  %v574_v4 = vpop.eup %323 }
  0x4d   :  { %v109_v54 = vmul.f32 1.442695, %v551_v46  ;;  %v143_v56 = vmul.f32 1.442695, %v553_v47  ;;  %v145_v57 = vmul.f32 1.442695, %v555_v48 }
  0x4e   :  { %325 = vpow2.f32 %v103_v50  ;;  %v147_v58 = vmul.f32 1.442695, %v561_v53  ;;  %v149_v60 = vmul.f32 1.442695, %v564_v55  ;;  %v208_v19 = vadd.f32 1.0, %v570_v61 }
  0x4f   :  { %327 = vpow2.f32 %v105_v51  ;;  %v217_v20 = vadd.f32 1.0, %v572_v63  ;;  %v226_v24 = vadd.f32 1.0, %v574_v4  ;;  %v211_v34 = vmul.f32 -0.5, %v570_v61 }
  0x50   :  { %329 = vpow2.f32 %v107_v52  ;;  %v220_v35 = vmul.f32 -0.5, %v572_v63  ;;  %v229_v36 = vmul.f32 -0.5, %v574_v4  ;;  %v214_v39 = vand.u32 2147483647, %v570_v61 }
  0x51   :  { %331 = vpow2.f32 %v109_v54  ;;  %v212_v50 = vadd.f32 1.0, %v211_v34 }
  0x52   :  { %333 = vpow2.f32 %v143_v56  ;;  %v221_v51 = vadd.f32 1.0, %v220_v35  ;;  %v180_v56 = vmax.f32 %v530_v0, 0.0  ;;  %v230_v59 = vadd.f32 1.0, %v229_v36 }
  0x53   :  { %335 = vpow2.f32 %v145_v57  ;;  %v181_v57 = vmax.f32 %v532_v1, 0.0  ;;  %vm607_vm0 = vcmp.lt.f32.partialorder %v214_v39, 0.0004427343  ;;  %v262_v35 = vlaneseq }
  0x54   :  { %337 = vpow2.f32 %v147_v58  ;;  %v182_v58 = vmax.f32 %v534_v2, 0.0 }
  0x55   :  { %339 = vpow2.f32 %v149_v60 }
  0x56   :  { %341 = vpow2.f32 %v206_v62  ;;  %v184_v62 = vmul.f32 %v82_v38, %v530_v0 }
  0x57   :  { %343 = vlog2.f32 %v208_v19 }
  0x58   :  { %v326_v5 = vpop.eup %325  ;;  %345 = vlog2.f32 %v217_v20 }
  0x59   :  { %v328_v6 = vpop.eup %327  ;;  %347 = vlog2.f32 %v226_v24  ;;  %v188_v24 = vsub.f32 %v180_v56, %v184_v62 }
  0x5a   :  { %v330_v7 = vpop.eup %329  ;;  %v111_v8 = vadd.f32 %v328_v6, %v326_v5  ;;  %v223_v5 = vand.u32 2147483647, %v572_v63  ;;  %v232_v6 = vand.u32 2147483647, %v574_v4 }
  0x5b   :  { %v332_v9 = vpop.eup %331 }
  0x5c   :  { %v576_v10 = vpop.eup %333  ;;  %v112_v11 = vadd.f32 %v330_v7, %v111_v8  ;;  %v185_v7 = vmul.f32 %v83_v41, %v532_v1  ;;  %v186_v8 = vmul.f32 %v84_v42, %v534_v2  ;;  %vm615_vm1 = vcmp.lt.f32.partialorder %v223_v5, 0.0004427343 }
  0x5d   :  { %v578_v12 = vpop.eup %335  ;;  %vm619_vm2 = vcmp.lt.f32.partialorder %v232_v6, 0.0004427343 }
  0x5e   :  { %v580_v13 = vpop.eup %337  ;;  %v113_v14 = vadd.f32 %v332_v9, %v112_v11  ;;  %v151_v15 = vadd.f32 %v578_v12, %v576_v10  ;;  %v85_v11 = vld [vmem:[#allocation8 + $0x18] sm:$0xff] }
  0x5f   :  { %v584_v16 = vpop.eup %339 }
  0x60   :  { %v114_v17 = vrot.slane %v113_v14, 4  ;;  %v152_v18 = vadd.f32 %v580_v13, %v151_v15  ;;  %v589_v21 = vpop.eup %341  ;;  %v213_v15 = vmul.f32 %v570_v61, %v212_v50  ;;  %v183_v61 = vmax.f32 %v536_v3, 0.0 }
  0x61   :  { %v235_v27 = vadd.f32 1.0, %v589_v21  ;;  %v344_v40 = vpop.eup %343  ;;  %v238_v52 = vmul.f32 -0.5, %v589_v21  ;;  %v241_v1 = vand.u32 2147483647, %v589_v21 }
  0x62   :  { %v115_v22 = vadd.f32 %v114_v17, %v113_v14  ;;  %v153_v23 = vadd.f32 %v584_v16, %v152_v18  ;;  %v346_v54 = vpop.eup %345  ;;  %v210_v14 = vmul.f32 0.6931472, %v344_v40  ;;  %v222_v17 = vmul.f32 %v572_v63, %v221_v51 }
  0x63   :  { %349 = vlog2.f32 %v235_v27  ;;  %v348_v60 = vpop.eup %347  ;;  %v239_v0 = vadd.f32 1.0, %v238_v52  ;;  %v219_v19 = vmul.f32 0.6931472, %v346_v54  ;;  %v187_v63 = vmul.f32 %v85_v11, %v536_v3 }
  0x64   :  { %v116_v25 = vrot.slane %v115_v22, 2  ;;  %v154_v26 = vrot.slane %v153_v23, 4  ;;  %v228_v20 = vmul.f32 0.6931472, %v348_v60  ;;  %v190_v27 = vsub.f32 %v182_v58, %v186_v8 }
  0x65   :  { %vm632_vm3 = vcmp.lt.f32.partialorder %v241_v1, 0.0004427343  ;;  %v191_v3 = vsub.f32 %v183_v61, %v187_v63 }
  0x66   :  { %v117_v28 = vadd.f32 %v116_v25, %v115_v22  ;;  %v155_v29 = vadd.f32 %v154_v26, %v153_v23  ;;  %v231_v22 = vmul.f32 %v574_v4, %v230_v59  ;;  %v189_v25 = vsub.f32 %v181_v57, %v185_v7 }
  0x67   :  { %v216_v4 = vsel %vm607_vm0, %v213_v15, %v210_v14  ;;  %v263_v59 = vand.u32 127, %v262_v35  ;;  %v456_v23 = vmov 0.0  }
  0x68   :  { %v118_v30 = vrot.slane %v117_v28, 1  ;;  %v156_v31 = vrot.slane %v155_v29, 2  ;;  %v244_v34 = vadd.f32 %v216_v4, %v188_v24  ;;  %73 = vst.msk [vmem:[#allocation2] sm:$0x1] %vm72_vm5, %v456_v23 }
  0x69   :  { %vm266_vm4 = vcmp.lt.s32.totalorder %v263_v59, 8 }
  0x6a   :  { %v119_v32 = vadd.f32 %v118_v30, %v117_v28  ;;  %v157_v33 = vadd.f32 %v156_v31, %v155_v29  ;;  %v240_v29 = vmul.f32 %v589_v21, %v239_v0  ;;  %v225_v31 = vsel %vm615_vm1, %v222_v17, %v219_v19 }
  0x6b   :  { %v245_v38 = vadd.f32 %v225_v31, %v189_v25  ;;  %v252_v5 = vmul.f32 0.3, %v244_v34 }
  0x6c   :  { %351 = vlog2.f32 %v119_v32  ;;  %v158_v37 = vrot.slane %v157_v33, 1  ;;  %v234_v32 = vsel %vm619_vm2, %v231_v22, %v228_v20 }
  0x6d   :  { %v350_v18 = vpop.eup %349  ;;  %v246_v39 = vadd.f32 %v234_v32, %v190_v27 }
  0x6e   :  { %v159_v49 = vadd.f32 %v158_v37, %v157_v33  ;;  %v237_v28 = vmul.f32 0.6931472, %v350_v18 }
  0x6f   :  { %v254_v6 = vmul.f32 0.3, %v246_v39 }
  0x70   :  { %353 = vlog2.f32 %v159_v49  ;;  %v243_v21 = vsel %vm632_vm3, %v240_v29, %v237_v28  ;;  %v271_v28 = vld [vmem:[#allocation2] sm:$0x1] }
  0x71   :  { %355 = vrcp.f32 %v159_v49 }
  0x76   :  { %v352_v26 = vpop.eup %351 }
  0x77   :  { %v121_v30 = vmul.f32 0.6931472, %v352_v26 }
  0x79   :  { %v122_v37 = vsub.f32 %v545_v43, %v121_v30  ;;  %v123_v41 = vsub.f32 %v547_v44, %v121_v30  ;;  %v124_v42 = vsub.f32 %v549_v45, %v121_v30  ;;  %v125_v49 = vsub.f32 %v551_v46, %v121_v30 }
  0x7a   :  { %v354_v36 = vpop.eup %353  ;;  %v247_v45 = vadd.f32 %v243_v21, %v191_v3 }
  0x7b   :  { %v356_v40 = vpop.eup %355  ;;  %v161_v50 = vmul.f32 0.6931472, %v354_v36 }
  0x7c   :  { %v168_v51 = vmul.f32 %v356_v40, %v576_v10  ;;  %v169_v52 = vmul.f32 %v356_v40, %v578_v12  ;;  %v170_v54 = vmul.f32 %v356_v40, %v580_v13  ;;  %v171_v43 = vmul.f32 %v356_v40, %v584_v16 }
  0x7d   :  { %v162_v56 = vsub.f32 %v553_v47, %v161_v50  ;;  %v163_v57 = vsub.f32 %v555_v48, %v161_v50  ;;  %v164_v58 = vsub.f32 %v561_v53, %v161_v50  ;;  %v165_v44 = vsub.f32 %v564_v55, %v161_v50 }
  0x7e   :  { %v253_v12 = vmul.f32 0.3, %v245_v38  ;;  %v255_v47 = vmul.f32 0.3, %v247_v45 }
  0x7f   :  { %v172_v46 = vsub.f32 %v162_v56, %v122_v37  ;;  %v173_v60 = vsub.f32 %v163_v57, %v123_v41  ;;  %v174_v62 = vsub.f32 %v164_v58, %v124_v42  ;;  %v175_v10 = vsub.f32 %v165_v44, %v125_v49 }
  0x81   :  { %v176_v13 = vmul.f32 %v172_v46, %v168_v51  ;;  %v177_v7 = vmul.f32 %v173_v60, %v169_v52  ;;  %v178_v16 = vmul.f32 %v174_v62, %v170_v54  ;;  %v179_v8 = vmul.f32 %v175_v10, %v171_v43 }
  0x83   :  { %v248_v9 = vmul.f32 11.2, %v176_v13  ;;  %v249_v48 = vmul.f32 11.2, %v177_v7  ;;  %v250_v11 = vmul.f32 11.2, %v178_v16 }
  0x84   :  { %v251_v53 = vmul.f32 11.2, %v179_v8 }
  0x85   :  { %v256_v55 = vadd.f32 %v252_v5, %v248_v9  ;;  %v257_v14 = vadd.f32 %v253_v12, %v249_v48  ;;  %v258_v15 = vadd.f32 %v254_v6, %v250_v11 }
  0x86   :  { %v259_v17 = vadd.f32 %v255_v47, %v251_v53 }
  0x87   :  { %v267_v0 = vsel %vm266_vm4, %v256_v55, 0.0  ;;  %v268_v18 = vsel %vm266_vm4, %v257_v14, 0.0  ;;  %v269_v19 = vsel %vm266_vm4, %v258_v15, 0.0 }
  0x88   :  { %v272_v20 = vadd.f32 %v268_v18, %v267_v0  ;;  %v270_v22 = vsel %vm266_vm4, %v259_v17, 0.0 }
  0x8a   :  { %v273_v1 = vadd.f32 %v272_v20, %v269_v19 }
  0x8c   :  { %v274_v2 = vadd.f32 %v273_v1, %v270_v22 }
  0x8e   :  { %275 = vadd.xlane.f32.xlu0 %v274_v2 }
 0x11b   :  { %v276_v61 = vpop.xlane.xlu0 %275 }
 0x11c   :  { %v277_v63 = vrot.slane %v276_v61, 4 }
 0x11e   :  { %v278_v24 = vadd.f32 %v277_v63, %v276_v61 }
 0x120   :  { %v279_v25 = vrot.slane %v278_v24, 2 }
 0x122   :  { %v280_v26 = vadd.f32 %v279_v25, %v278_v24 }
 0x124   :  { %v281_v27 = vrot.slane %v280_v26, 1 }
 0x126   :  { %v282_v4 = vadd.f32 %v281_v27, %v280_v26 }
 0x128   :  { %310 = vpush %v282_v4 }
 0x159   :  { %s311_s2 = spop %310 }
 0x15a   :  { %v284_v29 = vstv %s311_s2 }
 0x15b   :  { %v285_v30 = vadd.f32 %v284_v29, %v271_v28 }
 0x15d   :  { %287 = vst.msk [vmem:[#allocation2] sm:$0x1] %vm72_vm5, %v285_v30 }
 0x164   :  { %v291_v31 = vld [vmem:[#allocation2] sm:$0x1] }
 0x165   :  { %v292_v32 = vmul.f32 0.125, %v291_v31 }
 0x167   :  { %293 = vst.msk [vmem:[#allocation9] sm:$0x1] %vm72_vm5, %v292_v32 }
 0x168   :  { %434 = shalt.err (!%p431_p0)
}
 0x169   :  { %s435_s27 = scalar_lea.hbm %s668_s3, 16 }
 0x16a   :  { %p436_p1 = scmp.ne.s32.totalorder %s668_s3, %s435_s27  ;;  %p439_p2 = scmp.lt.u32.totalorder %s435_s27, %s668_s3 }
 0x16c   :  { %p441_p3 = pnand %p439_p2, %p436_p1 }
 0x16e   :  { %444 = shalt.err (!%p441_p3)
}
 0x16f   :  { %303 = dma.vmem_to_hbm [thread:$0]  %s301_s22, 16, %s668_s3, [#allocation5]  }
 0x170   :  { %449 = dma.done.wait [#allocation5], 16  }
 0x171   :  { %450 = vsyncadd [#allocation5], 4294967280 }
 0x172   :  { %307 = vsyncpa [#allocation4], 1 }
 0x173   :  { %308 = vsyncpa [#allocation7], 1 }
 0x174   :  { %309 = vsyncpa [#allocation5], 1 }

</bundles_post_ra>
